<compile_context>
chip_gen: v6e
topology: v6e:2x2x1
jax: 0.10.0
libtpu: 0.0.40
codegen_flags: <defaults>
</compile_context>

<pallas_src>
import functools

import jax
import jax.numpy as jnp
from jax.experimental import pallas as pl
from jax.experimental.pallas import tpu as pltpu


_ROW_TARGET = 512          # rows per tile target (~85% of HBM roofline per measured data)
_MIN_ROW_STEPS = 8         # want >= ~8 grid steps along the parallel (row) axis
_MAX_HW_TILE_LANES = 8192  # bounds in-kernel unroll (<= 64 lane-chunks of 128)
_RSUB = 64                 # rows per in-register partial (8 f32 vregs -> no spill risk)


def _round_down(a, b):
    return (a // b) * b


def _round_up(a, b):
    return ((a + b - 1) // b) * b


def _vmem_capacity_bytes():
    try:
        cap = int(pltpu.get_tpu_info().vmem_capacity_bytes)
        if cap > 0:
            return cap
    except Exception:
        pass
    return 64 * 1024 * 1024    # conservative fallback = v7x per-core VMEM


def _spoc_kernel(x_ref, o_ref, acc_ref, *, inv_hw, hw_tile, hw_last):
    """Grid = (row_tiles [parallel], hw_tiles [arbitrary/reduction]).

    x_ref  : (row_tile, hw_tile) input block (last hw block has hw_last valid lanes).
    o_ref  : (1, row_tile) lane-dense output block (same block across the hw axis).
    acc_ref: (row_tile, 128) f32 VMEM accumulator of per-row lane-partial sums.
    """
    k = pl.program_id(1)
    nk = pl.num_programs(1)
    row_tile = acc_ref.shape[0]

    @pl.when(k == 0)
    def _():
        acc_ref[...] = jnp.zeros_like(acc_ref)

    def accumulate(width):
        # VPU pre-reduction: add all full 128-lane chunks of x_ref[:, :width] into
        # acc_ref, _RSUB rows at a time to bound live vregs (exact f32 adds).
        n128 = width // 128
        if n128 == 0:
            return
        for r0 in range(0, row_tile, _RSUB):
            rs = min(_RSUB, row_tile - r0)
            part = x_ref[pl.ds(r0, rs), pl.ds(0, 128)].astype(jnp.float32)
            for j in range(1, n128):
                part = part + x_ref[pl.ds(r0, rs), pl.ds(j * 128, 128)].astype(jnp.float32)
            acc_ref[pl.ds(r0, rs), :] += part

    if hw_tile == hw_last:
        # Every hw block has the same valid width (covers the single-block case).
        accumulate(hw_tile)
    else:
        @pl.when(k < nk - 1)
        def _():
            accumulate(hw_tile)            # full blocks: hw_tile is a multiple of 128

        n_full_last = _round_down(hw_last, 128)
        if n_full_last:
            @pl.when(k == nk - 1)
            def _():
                accumulate(n_full_last)    # full 128-chunks of the (partial) last block

    @pl.when(k == nk - 1)
    def _():
        rem = hw_last % 128
        if rem:
            # Fold the (<128-lane) tail of the last hw block into the accumulator.
            base = hw_last - rem
            tail = x_ref[:, pl.ds(base, rem)].astype(jnp.float32)
            pad = jnp.zeros((row_tile, 128 - rem), jnp.float32)
            acc_ref[...] += jnp.concatenate([tail, pad], axis=1)
        # One tiny ones-matmul reduces the 128-wide partials AND transposes them
        # into the lane-dense (1, row_tile) output layout (idle MXU, exact enough).
        ones = jnp.ones((1, 128), jnp.float32)
        sums = jax.lax.dot_general(
            ones, acc_ref[...],
            dimension_numbers=(((1,), (1,)), ((), ())),
            preferred_element_type=jnp.float32,
            precision=jax.lax.Precision.HIGHEST,
        )
        o_ref[...] = (sums * inv_hw).astype(o_ref.dtype)


def spoc_pallas(x):
    """x: (N, C, H, W) -> (N, C, 1, 1), matching SPoC.forward (mean over H, W)."""
    N, C, H, W = x.shape
    nc, hw = N * C, H * W
    x2 = x.reshape(nc, hw)                      # contiguous reshape: no copy

    itemsize = jnp.dtype(x.dtype).itemsize
    # Sublane packing multiple: 8 for f32, 16 for bf16, 32 for int8/fp8 inputs.
    sub = max(8, 32 // itemsize)

    vmem_cap = _vmem_capacity_bytes()
    tile_budget = vmem_cap // 3                 # double-buffered input tile budget
    vmem_limit = vmem_cap // 2                  # scoped-VMEM limit we request

    # ---- hw (reduction) tiling -------------------------------------------------
    row_cap = min(_ROW_TARGET, _round_up(nc, sub))
    lane_budget = _round_down(tile_budget // (2 * row_cap * itemsize), 128)
    lane_budget = max(128, min(lane_budget, _MAX_HW_TILE_LANES))
    hwp = _round_up(hw, 128)                    # lane-padded width resident in VMEM
    if hwp <= lane_budget:
        hw_tile, num_hw_tiles = hw, 1
    else:
        hw_tile = lane_budget                   # multiple of 128
        num_hw_tiles = -(-hw // hw_tile)
    hw_last = hw - (num_hw_tiles - 1) * hw_tile
    hwp_tile = _round_up(hw_tile, 128)

    # ---- row (parallel) tiling -------------------------------------------------
    if nc <= sub:
        row_tile = nc                           # block covers the full row dim
    else:
        fit = _round_down(tile_budget // (2 * hwp_tile * itemsize), sub)
        row_tile = max(sub, min(_ROW_TARGET, fit, _round_down(nc, sub)))
        # Guarantee enough grid steps along the parallel axis when nc allows
        # (keeps both v7x TensorCores busy + lets the DMA pipeline overlap).
        steps_cap = _round_down(nc // _MIN_ROW_STEPS, sub)
        if steps_cap >= sub:
            row_tile = min(row_tile, steps_cap)
    num_row_tiles = -(-nc // row_tile)          # ceil-div; tail row block is partial

    kernel = functools.partial(
        _spoc_kernel, inv_hw=1.0 / float(hw), hw_tile=hw_tile, hw_last=hw_last)

    cost = pl.CostEstimate(
        flops=nc * hw,
        transcendentals=0,
        bytes_accessed=nc * hw * itemsize + nc * itemsize,
    )

    out = pl.pallas_call(
        kernel,
        out_shape=jax.ShapeDtypeStruct((num_row_tiles, row_tile), x.dtype),
        grid_spec=pltpu.PrefetchScalarGridSpec(
            num_scalar_prefetch=0,
            grid=(num_row_tiles, num_hw_tiles),
            in_specs=[pl.BlockSpec((row_tile, hw_tile), lambda i, k: (i, k))],
            out_specs=pl.BlockSpec((1, row_tile), lambda i, k: (i, 0)),
            scratch_shapes=[pltpu.VMEM((row_tile, 128), jnp.float32)],
        ),
        compiler_params=pltpu.CompilerParams(
            dimension_semantics=("parallel", "arbitrary"),
            vmem_limit_bytes=vmem_limit,
        ),
        cost_estimate=cost,
    )(x2)

    # Drop lanes written by the partial tail row block, restore (N, C, 1, 1).
    return out.reshape(num_row_tiles * row_tile)[:nc].reshape(N, C, 1, 1)


def spoc_reference(x):
    """Pure-JAX reference mirroring the PyTorch forward (avg_pool2d over H, W)."""
    pooled = jnp.mean(x.astype(jnp.float32), axis=(2, 3), keepdims=True)
    return pooled.astype(x.dtype)


def _check(x, atol):
    y = spoc_pallas(x)
    jax.block_until_ready(y)
    y_ref = spoc_reference(x)
    assert y.shape == x.shape[:2] + (1, 1), y.shape
    assert jnp.allclose(y, y_ref, atol=atol, rtol=1e-5), (
        x.shape, float(jnp.max(jnp.abs(y - y_ref))))


if __name__ == "__main__":
    keys = jax.random.split(jax.random.PRNGKey(0), 3)

    # Primary small NCHW feature map consistent with what SPoC pooling consumes.
    _check(jax.random.uniform(keys[0], (2, 4, 16, 16), dtype=jnp.float32), atol=1e-5)

    # Multiple row tiles + partial tail row block + hw<128 remainder path (7x7).
    _check(jax.random.uniform(keys[1], (3, 10, 7, 7), dtype=jnp.float32), atol=1e-5)

    # Large-hw path: exercises the hw reduction grid axis (2 chunks) + accumulator.
    _check(jax.random.uniform(keys[2], (1, 16, 96, 96), dtype=jnp.float32), atol=5e-5)

    print("KERNEL_OK")
</pallas_src>

<mosaic_0001>
module attributes {stable_mosaic.version = 11 : i64} {
  func.func @_spoc_kernel(%arg0: i32, %arg1: i32, %arg2: memref<8x256xf32, #tpu.memory_space<vmem>>, %arg3: memref<1x8xf32, #tpu.memory_space<vmem>>, %arg4: memref<8x128xf32, #tpu.memory_space<vmem>>) attributes {dimension_semantics = [#tpu.dimension_semantics<parallel>, #tpu.dimension_semantics<arbitrary>], iteration_bounds = array<i64: 1, 1>, scalar_prefetch = 0 : i64, scratch_operands = 1 : i64, tpu.core_type = #tpu.core_type<tc>, window_params = [{transform_indices = @transform_0, window_bounds = array<i64: 8, 256>}, {transform_indices = @transform_1, window_bounds = array<i64: 1, 8>}]} {
    %c0_i32 = arith.constant 0 : i32
    %0 = arith.cmpi eq, %arg1, %c0_i32 : i32
    %1 = arith.extui %0 : i1 to i32
    %c0_i32_0 = arith.constant 0 : i32
    %2 = arith.cmpi ne, %1, %c0_i32_0 : i32
    scf.if %2 {
      %cst = arith.constant 0.000000e+00 : f32
      %12 = vector.broadcast %cst : f32 to vector<8x128xf32>
      %c0_9 = arith.constant 0 : index
      %c0_10 = arith.constant 0 : index
      %13 = vector.load %arg4[%c0_9, %c0_10] : memref<8x128xf32, #tpu.memory_space<vmem>>, vector<8x128xf32>
      tpu.vector_store %arg4[%c0_9, %c0_10], %12 {strides = array<i32>} : memref<8x128xf32, #tpu.memory_space<vmem>>, vector<8x128xf32>,
    } else {
    }
    %c0 = arith.constant 0 : index
    %c0_1 = arith.constant 0 : index
    %3 = vector.load %arg2[%c0, %c0_1] : memref<8x256xf32, #tpu.memory_space<vmem>>, vector<8x128xf32>
    %c0_2 = arith.constant 0 : index
    %c128 = arith.constant 128 : index
    %4 = vector.load %arg2[%c0_2, %c128] : memref<8x256xf32, #tpu.memory_space<vmem>>, vector<8x128xf32>
    %5 = arith.addf %3, %4 : vector<8x128xf32>
    %c0_3 = arith.constant 0 : index
    %c0_4 = arith.constant 0 : index
    %6 = vector.load %arg4[%c0_3, %c0_4] : memref<8x128xf32, #tpu.memory_space<vmem>>, vector<8x128xf32>
    %7 = arith.addf %6, %5 : vector<8x128xf32>
    %c0_5 = arith.constant 0 : index
    %c0_6 = arith.constant 0 : index
    %8 = vector.load %arg4[%c0_5, %c0_6] : memref<8x128xf32, #tpu.memory_space<vmem>>, vector<8x128xf32>
    tpu.vector_store %arg4[%c0_5, %c0_6], %7 {strides = array<i32>} : memref<8x128xf32, #tpu.memory_space<vmem>>, vector<8x128xf32>,
    %c0_i32_7 = arith.constant 0 : i32
    %9 = arith.cmpi eq, %arg1, %c0_i32_7 : i32
    %10 = arith.extui %9 : i1 to i32
    %c0_i32_8 = arith.constant 0 : i32
    %11 = arith.cmpi ne, %10, %c0_i32_8 : i32
    scf.if %11 {
      %cst = arith.constant 1.000000e+00 : f32
      %12 = vector.broadcast %cst : f32 to vector<1x128xf32>
      %c0_9 = arith.constant 0 : index
      %c0_10 = arith.constant 0 : index
      %13 = vector.load %arg4[%c0_9, %c0_10] : memref<8x128xf32, #tpu.memory_space<vmem>>, vector<8x128xf32>
      %cst_11 = arith.constant dense<0.000000e+00> : vector<1x8xf32>
      %14 = tpu.matmul %12, %13, %cst_11 {dimension_numbers = #tpu.dot_dimension_numbers<[1], [1], [0], [0], [0, 0, 1, 0], [], []>, precision = #tpu.contract_precision<fp32>} : vector<1x128xf32>, vector<8x128xf32>, vector<1x8xf32> -> vector<1x8xf32>
      %cst_12 = arith.constant 3.906250e-03 : f32
      %15 = vector.broadcast %cst_12 : f32 to vector<1x8xf32>
      %16 = arith.mulf %14, %15 : vector<1x8xf32>
      %c0_13 = arith.constant 0 : index
      %c0_14 = arith.constant 0 : index
      %17 = vector.load %arg3[%c0_13, %c0_14] : memref<1x8xf32, #tpu.memory_space<vmem>>, vector<1x8xf32>
      tpu.vector_store %arg3[%c0_13, %c0_14], %16 {strides = array<i32>} : memref<1x8xf32, #tpu.memory_space<vmem>>, vector<1x8xf32>,
    } else {
    }
    return
  }
  func.func @transform_0(%arg0: i32, %arg1: i32) -> (i32, i32) {
    %c0_i32 = arith.constant 0 : i32
    return %arg0, %arg1 : i32, i32
  }
  func.func @transform_1(%arg0: i32, %arg1: i32) -> (i32, i32) {
    %c0_i32 = arith.constant 0 : i32
    %c0_i32_0 = arith.constant 0 : i32
    return %arg0, %c0_i32 : i32, i32
  }
}

</mosaic_0001>

<bundles_post_ra>
// kernel: tpu_custom_call.1
= control target key start
LH: loop header
LB: loop body
LE: loop exit
PB: predicated region body
PF: predicated region fallthrough
CT: control target
= control target key end

     0   :  { %6 = vsyncpa [#allocation4], 0  ;;  %s605_s0 = inlined_call_operand.hbm [shape: f32[8,256], index: 0, kind: input, shape index: {}]   ;;  %s606_s1 = inlined_call_operand.hbm [shape: f32[1,8], index: 1, kind: output, shape index: {}]  }
   0x1   :  { %7 = vsyncpa [#allocation5], 0  ;;  %s578_s6 = smov [#allocation3]  }
   0x2   :  { %s14_s7 = sshll.u32 %s578_s6, 4  ;;  %s15_s7 = int_to_ptr.vmem [resolvable:$true] %s14_s7 }
   0x3   :  { %s542_s8 = scalar_lea.vmem %s15_s7, 256  ;;  %p547_p1 = scmp.lt.s32.totalorder %s15_s7, %s15_s7 }
   0x4   :  { %p543_p0 = scmp.ne.s32.totalorder %s15_s7, %s542_s8  ;;  %p548_p2 = scmp.lt.s32.totalorder %s542_s8, %s542_s8 }
   0x6   :  { %p549_p3 = por %p548_p2, %p547_p1 }
   0x8   :  { %p550_p4 = pnand %p549_p3, %p543_p0 }
   0xa   :  { %553 = shalt.err (!%p550_p4)
}
   0xb   :  { %17 = dma.hbm_to_vmem [thread:$0]  %s605_s0, 256, %s15_s7, [#allocation4]  }
   0xc   :  { %574 = dma.done.wait [#allocation4], 256  }
   0xd   :  { %575 = vsyncadd [#allocation4], 4294967040  ;;  %v579_v0 = vmov 0.0   ;;  %vm580_vm0 = vmmov 0   ;;  %v26_v1 = vld [vmem:[#allocation3] sm:$0xff]  ;;  %v27_v2 = vld [vmem:[#allocation3 + $0x8] sm:$0xff] }
   0xe   :  { %499 = vmatprep.subr.mxu0 %v579_v0  ;;  %501 = vmatprep.mubr.msk.f32.mxu0 %vm580_vm0, %v579_v0  ;;  %v28_v3 = vadd.f32 %v27_v2, %v26_v1  ;;  %v581_v9 = vmov 1.0   ;;  %s582_s0 = smov [#allocation6]   ;;  %vm470_vm1 = vcmask 57344  }
   0xf   :  { %504 = vmatprep.subr.mxu1 %v579_v0  ;;  %506 = vmatprep.mubr.msk.f32.mxu1 %vm580_vm0, %v579_v0  ;;  %s478_s11 = sshll.u32 %s582_s0, 4  ;;  %s479_s11 = int_to_ptr.vmem [resolvable:$true] %s478_s11 }
  0x10   :  { %v67_v4 = vand.u32 4294901760, %v28_v3  ;;  %s554_s12 = scalar_lea.vmem %s479_s11, 16  ;;  %s558_s13 = scalar_lea.vmem %s479_s11, 32 }
  0x11   :  { %p555_p5 = scmp.ne.s32.totalorder %s479_s11, %s554_s12  ;;  %p559_p6 = scmp.lt.s32.totalorder %s479_s11, %s479_s11 }
  0x12   :  { %500 = vmatpush3.xpose.msra.mxu0 %v67_v4  ;;  %v139_v5 = vsub.f32 %v28_v3, %v67_v4  ;;  %p560_p7 = scmp.lt.s32.totalorder %s558_s13, %s554_s12 }
  0x13   :  { %509 = vmatprep.subr.mxu0 %v579_v0 }
  0x14   :  { %v140_v6 = vand.u32 4294901760, %v139_v5  ;;  %p561_p8 = por %p560_p7, %p559_p6 }
  0x15   :  { %502 = vmatmul.mubr.f32.vlgmr.msra.gmra.mxu0 %v579_v0 }
  0x16   :  { %v141_v7 = vsub.f32 %v139_v5, %v140_v6  ;;  %510 = vmatpush3.xpose.msra.mxu0 %v139_v5  ;;  %511 = vmatprep.mubr.msk.f32.mxu0 %vm580_vm0, %v579_v0  ;;  %p562_p9 = pnand %p561_p8, %p555_p5 }
  0x17   :  { %519 = vmatprep.subr.mxu0 %v579_v0 }
  0x18   :  { %v142_v8 = vand.u32 4294901760, %v141_v7 }
  0x19   :  { %512 = vmatmul.mubr.f32.vlgmr.msra.gmra.mxu0 %v579_v0 }
  0x1a   :  { %505 = vmatpush3.xpose.msra.mxu1 %v142_v8  ;;  %520 = vmatpush3.xpose.msra.mxu0 %v140_v6 }
  0x1b   :  { %514 = vmatprep.subr.mxu1 %v579_v0  ;;  %521 = vmatprep.mubr.msk.f32.mxu0 %vm580_vm0, %v579_v0 }
  0x1d   :  { %507 = vmatmul.mubr.f32.vlgmr.msra.gmra.mxu1 %v581_v9  ;;  %522 = vmatmul.mubr.f32.vlgmr.msra.gmra.mxu0 %v581_v9 }
  0x1e   :  { %515 = vmatpush3.xpose.msra.mxu1 %v67_v4  ;;  %516 = vmatprep.mubr.msk.f32.mxu1 %vm580_vm0, %v579_v0 }
  0x1f   :  { %524 = vmatprep.subr.mxu1 %v579_v0 }
  0x21   :  { %517 = vmatmul.mubr.f32.vlgmr.msra.gmra.mxu1 %v579_v0 }
  0x22   :  { %525 = vmatpush3.xpose.msra.mxu1 %v67_v4  ;;  %526 = vmatprep.mubr.msk.f32.mxu1 %vm580_vm0, %v579_v0 }
  0x25   :  { %527 = vmatmul.mubr.f32.vlgmr.msra.gmra.mxu1 %v581_v9 }
  0xd5   :  { %v103_v10 = vpop.f32.mrf.mxu0 }
  0xd7   :  { %v503_v11 = vpop.f32.mrf.mxu0 }
  0xd9   :  { %v250_v12 = vpop.f32.mrf.mxu0 }
  0xdb   :  { %v513_v13 = vpop.f32.mrf.mxu0 }
  0xdd   :  { %v178_v14 = vpop.f32.mrf.mxu1  ;;  %v394_v15 = vpop.f32.mrf.mxu0 }
  0xde   :  { %v179_v16 = vadd.f32 %v178_v14, %v103_v10 }
  0xdf   :  { %v508_v17 = vpop.f32.mrf.mxu1  ;;  %v523_v18 = vpop.f32.mrf.mxu0 }
  0xe0   :  { %v251_v19 = vadd.f32 %v250_v12, %v179_v16 }
  0xe1   :  { %v321_v20 = vpop.f32.mrf.mxu1 }
  0xe2   :  { %v322_v21 = vadd.f32 %v321_v20, %v251_v19 }
  0xe3   :  { %v518_v22 = vpop.f32.mrf.mxu1 }
  0xe4   :  { %v395_v23 = vadd.f32 %v394_v15, %v322_v21 }
  0xe5   :  { %v465_v24 = vpop.f32.mrf.mxu1 }
  0xe6   :  { %v466_v25 = vadd.f32 %v465_v24, %v395_v23 }
  0xe7   :  { %v528_v26 = vpop.f32.mrf.mxu1 }
  0xe8   :  { %v469_v27 = vmul.f32 0.00390625, %v466_v25 }
  0xea   :  { %471 = vst.msk [vmem:[#allocation6] sm:$0x1] %vm470_vm1, %v469_v27 }
  0xeb   :  { %565 = shalt.err (!%p562_p9)
}
  0xec   :  { %481 = dma.vmem_to_hbm [thread:$0]  %s479_s11, 16, %s606_s1, [#allocation5]  }
  0xed   :  { %576 = dma.done.wait [#allocation5], 16  }
  0xee   :  { %577 = vsyncadd [#allocation5], 4294967280 }
  0xef   :  { %485 = vsyncpa [#allocation4], 1 }
  0xf0   :  { %486 = vsyncpa [#allocation5], 1 }

</bundles_post_ra>
